<compile_context>
chip_gen: v7x
topology: tpu7x:2x2x1
jax: 0.10.0
libtpu: 0.0.40
codegen_flags: <defaults>
</compile_context>

<pallas_src>
import functools

import jax
import jax.numpy as jnp
from jax.experimental import pallas as pl
from jax.experimental.pallas import tpu as pltpu


def _cdiv(a, b):
    return -(-a // b)


def _round_up(n, m):
    return _cdiv(n, m) * m


def udec_encoder_kernel(x_ref, w1_ref, b1_ref, w2_ref, b2_ref, z_ref, *,
                        epilogue_dtype):
    # x arrives unpadded in its original dtype; cast to bf16 just before the
    # MXU (free under the DMA bottleneck). f32 accumulation on both dots.
    x = x_ref[...].astype(jnp.bfloat16)                               # (TB, K)
    h = jnp.dot(x, w1_ref[...], preferred_element_type=jnp.float32)   # (TB, H) f32
    # Bias + ReLU epilogue: bf16 on v6e/v7x, f32 on v5e (chosen by wrapper).
    h = jnp.maximum(h.astype(epilogue_dtype) + b1_ref[...].astype(epilogue_dtype),
                    0.0)
    z = jnp.dot(h.astype(jnp.bfloat16), w2_ref[...],
                preferred_element_type=jnp.float32)                   # (TB, Z) f32
    z_ref[...] = (z + b2_ref[...]).astype(z_ref.dtype)
    # TODO(synk): dropout>0 path of buildNetwork not implemented (module default dropout=0).


def _default_epilogue_dtype():
    """bf16 epilogue on chips with a bf16 VALU (v6e/v7x); f32 on v5e/v5p."""
    try:
        kind = jax.devices()[0].device_kind.lower()
    except Exception:  # pragma: no cover - defensive; default to bf16
        kind = ""
    return jnp.float32 if "v5" in kind else jnp.bfloat16


def udec_encoder_forward(x, w1, b1, w2, b2, *, block_b=1024, epilogue_dtype=None):
    """z = ReLU(x @ w1 + b1) @ w2 + b2, computed in one fused Pallas kernel.

    x : (B, input_dim)
    w1: (input_dim, hidden),  b1: (1, hidden)
    w2: (hidden, z_dim),      b2: (1, z_dim)
    returns (B, z_dim) float32
    """
    B, input_dim = x.shape
    hidden = w1.shape[1]
    z_dim = w2.shape[1]
    if epilogue_dtype is None:
        epilogue_dtype = _default_epilogue_dtype()

    # Batch tiling: multiples of 8 sublanes, balanced across cdiv(B, block_b)
    # tiles so an awkward B never wastes close to a whole extra tile of work.
    # (When B > block_b the grid has >=2 steps, letting v7x's two TensorCores
    # both take batch tiles via the "parallel" axis.)
    if B <= block_b:
        tb = _round_up(B, 8)
    else:
        tb = _round_up(_cdiv(B, _cdiv(B, block_b)), 8)
    grid = (_cdiv(B, tb),)

    # Weights cast to bf16 once in the wrapper (tiny, reused by every batch
    # tile); biases stay f32. x is passed through untouched — the kernel casts
    # it, so there is no extra XLA pad/convert pass over the activations.
    # Feature dims are NOT padded: block dims equal to the full array dims are
    # exempt from the (8,128) rule and the kernel is HBM-bound, so masked
    # lanes on sub-128 dims are not the bottleneck.
    w1b = w1.astype(jnp.bfloat16)
    w2b = w2.astype(jnp.bfloat16)
    b1f = b1.astype(jnp.float32)
    b2f = b2.astype(jnp.float32)
    # NOTE: the weight/bias operands have constant index_maps; if VMEM gets
    # tight at large hidden dims they can be single-buffered with
    # pipeline_mode=pl.Buffered(1). Irrelevant at these sizes, so omitted.
    # TODO(synk): on v7x, fp8 weights would halve weight VMEM/DMA and double
    # peak MXU rate, but needs an accuracy check; bf16 kept for portability.

    # Advisory cost estimate so XLA can schedule/overlap around the call.
    flops = 2 * B * (input_dim * hidden + hidden * z_dim)
    bytes_accessed = int(
        x.size * x.dtype.itemsize          # activations in
        + B * z_dim * 4                    # z out (f32, unpadded)
        + w1b.size * 2 + w2b.size * 2      # bf16 weights
        + b1f.size * 4 + b2f.size * 4)     # biases

    # Rough VMEM budget: double-buffered x / z tiles + resident (double-
    # buffered) weights + the (TB, hidden) intermediate, with headroom.
    # Floor at the 32 MiB scoped default, cap well under v7x's 64 MiB physical.
    vmem_need = (2 * tb * input_dim * 4 + 2 * tb * z_dim * 4
                 + 2 * (w1b.size + w2b.size) * 2
                 + (b1f.size + b2f.size) * 8
                 + 2 * tb * hidden * 4)
    vmem_limit = int(min(max(vmem_need + (8 << 20), 32 << 20), 56 << 20))

    kernel = functools.partial(udec_encoder_kernel, epilogue_dtype=epilogue_dtype)

    z = pl.pallas_call(
        kernel,
        out_shape=jax.ShapeDtypeStruct((B, z_dim), jnp.float32),
        grid=grid,
        in_specs=[
            pl.BlockSpec((tb, input_dim), lambda i: (i, 0)),      # x: streams over batch
            pl.BlockSpec((input_dim, hidden), lambda i: (0, 0)),  # w1: VMEM resident
            pl.BlockSpec((1, hidden), lambda i: (0, 0)),          # b1: VMEM resident
            pl.BlockSpec((hidden, z_dim), lambda i: (0, 0)),      # w2: VMEM resident
            pl.BlockSpec((1, z_dim), lambda i: (0, 0)),           # b2: VMEM resident
        ],
        out_specs=pl.BlockSpec((tb, z_dim), lambda i: (i, 0)),    # z: unpadded lanes
        compiler_params=pltpu.CompilerParams(
            dimension_semantics=("parallel",),   # shard batch tiles across TCs (v7x)
            vmem_limit_bytes=vmem_limit,
        ),
        cost_estimate=pl.CostEstimate(
            flops=flops, transcendentals=0, bytes_accessed=bytes_accessed),
    )(x, w1b, b1f, w2b, b2f)
    return z


def init_params(key, input_dim, hidden, z_dim):
    """Deterministic synthetic params mimicking nn.Linear's uniform init."""
    k1, k2, k3, k4 = jax.random.split(key, 4)
    lim1 = 1.0 / jnp.sqrt(input_dim)
    lim2 = 1.0 / jnp.sqrt(hidden)
    w1 = jax.random.uniform(k1, (input_dim, hidden), jnp.float32, -lim1, lim1)
    b1 = jax.random.uniform(k2, (1, hidden), jnp.float32, -lim1, lim1)
    w2 = jax.random.uniform(k3, (hidden, z_dim), jnp.float32, -lim2, lim2)
    b2 = jax.random.uniform(k4, (1, z_dim), jnp.float32, -lim2, lim2)
    return w1, b1, w2, b2


if __name__ == "__main__":
    # Small shapes consistent with the module's MLP forward:
    # UDEC_encoder(input_dim=64, z_dim=16, encodeLayer=[32]) at batch 8.
    B, input_dim, hidden, z_dim = 8, 64, 32, 16

    key = jax.random.PRNGKey(0)
    kx, kp = jax.random.split(key)
    x = jax.random.normal(kx, (B, input_dim), jnp.float32)
    w1, b1, w2, b2 = init_params(kp, input_dim, hidden, z_dim)

    z = udec_encoder_forward(x, w1, b1, w2, b2)
    jax.block_until_ready(z)

    # Pure-JAX f32 reference of the same semantics. The kernel uses bf16 MXU
    # operands (and a bf16 epilogue on v6e/v7x) with f32 accumulation, so the
    # tolerance is relaxed accordingly.
    z_ref = jnp.maximum(x @ w1 + b1, 0.0) @ w2 + b2
    assert z.shape == (B, z_dim)
    assert jnp.allclose(z, z_ref, atol=7e-2, rtol=7e-2), (
        float(jnp.max(jnp.abs(z - z_ref))))

    print("KERNEL_OK")
</pallas_src>

<mosaic_0001>
module attributes {stable_mosaic.version = 11 : i64} {
  func.func @udec_encoder_kernel(%arg0: i32, %arg1: memref<8x64xf32, #tpu.memory_space<vmem>>, %arg2: memref<64x32xbf16, #tpu.memory_space<vmem>>, %arg3: memref<1x32xf32, #tpu.memory_space<vmem>>, %arg4: memref<32x16xbf16, #tpu.memory_space<vmem>>, %arg5: memref<1x16xf32, #tpu.memory_space<vmem>>, %arg6: memref<8x16xf32, #tpu.memory_space<vmem>>) attributes {dimension_semantics = [#tpu.dimension_semantics<parallel>], iteration_bounds = array<i64: 1>, scalar_prefetch = 0 : i64, scratch_operands = 0 : i64, tpu.core_type = #tpu.core_type<tc>, window_params = [{transform_indices = @transform_0, window_bounds = array<i64: 8, 64>}, {pipeline_mode = #tpu.pipeline_mode<synchronous>, transform_indices = @transform_1, window_bounds = array<i64: 64, 32>}, {pipeline_mode = #tpu.pipeline_mode<synchronous>, transform_indices = @transform_2, window_bounds = array<i64: 1, 32>}, {pipeline_mode = #tpu.pipeline_mode<synchronous>, transform_indices = @transform_3, window_bounds = array<i64: 32, 16>}, {pipeline_mode = #tpu.pipeline_mode<synchronous>, transform_indices = @transform_4, window_bounds = array<i64: 1, 16>}, {transform_indices = @transform_5, window_bounds = array<i64: 8, 16>}]} {
    %c0 = arith.constant 0 : index
    %c0_0 = arith.constant 0 : index
    %0 = vector.load %arg1[%c0, %c0_0] : memref<8x64xf32, #tpu.memory_space<vmem>>, vector<8x64xf32>
    %1 = arith.truncf %0 : vector<8x64xf32> to vector<8x64xbf16>
    %c0_1 = arith.constant 0 : index
    %c0_2 = arith.constant 0 : index
    %2 = vector.load %arg2[%c0_1, %c0_2] : memref<64x32xbf16, #tpu.memory_space<vmem>>, vector<64x32xbf16>
    %cst = arith.constant dense<0.000000e+00> : vector<8x32xf32>
    %3 = tpu.matmul %1, %2, %cst {dimension_numbers = #tpu.dot_dimension_numbers<[1], [0], [0], [1], [0, 0, 1, 1], [], []>} : vector<8x64xbf16>, vector<64x32xbf16>, vector<8x32xf32> -> vector<8x32xf32>
    %4 = arith.truncf %3 : vector<8x32xf32> to vector<8x32xbf16>
    %c0_3 = arith.constant 0 : index
    %c0_4 = arith.constant 0 : index
    %5 = vector.load %arg3[%c0_3, %c0_4] : memref<1x32xf32, #tpu.memory_space<vmem>>, vector<1x32xf32>
    %6 = arith.truncf %5 : vector<1x32xf32> to vector<1x32xbf16>
    %7 = vector.broadcast %6 : vector<1x32xbf16> to vector<8x32xbf16>
    %8 = arith.addf %4, %7 : vector<8x32xbf16>
    %cst_5 = arith.constant 0.000000e+00 : bf16
    %9 = vector.broadcast %cst_5 : bf16 to vector<8x32xbf16>
    %10 = arith.maximumf %8, %9 : vector<8x32xbf16>
    %c0_6 = arith.constant 0 : index
    %c0_7 = arith.constant 0 : index
    %11 = vector.load %arg4[%c0_6, %c0_7] : memref<32x16xbf16, #tpu.memory_space<vmem>>, vector<32x16xbf16>
    %cst_8 = arith.constant dense<0.000000e+00> : vector<8x16xf32>
    %12 = tpu.matmul %10, %11, %cst_8 {dimension_numbers = #tpu.dot_dimension_numbers<[1], [0], [0], [1], [0, 0, 1, 1], [], []>} : vector<8x32xbf16>, vector<32x16xbf16>, vector<8x16xf32> -> vector<8x16xf32>
    %c0_9 = arith.constant 0 : index
    %c0_10 = arith.constant 0 : index
    %13 = vector.load %arg5[%c0_9, %c0_10] : memref<1x16xf32, #tpu.memory_space<vmem>>, vector<1x16xf32>
    %14 = vector.broadcast %13 : vector<1x16xf32> to vector<8x16xf32>
    %15 = arith.addf %12, %14 : vector<8x16xf32>
    %c0_11 = arith.constant 0 : index
    %c0_12 = arith.constant 0 : index
    %16 = vector.load %arg6[%c0_11, %c0_12] : memref<8x16xf32, #tpu.memory_space<vmem>>, vector<8x16xf32>
    tpu.vector_store %arg6[%c0_11, %c0_12], %15 {strides = array<i32>} : memref<8x16xf32, #tpu.memory_space<vmem>>, vector<8x16xf32>,
    return
  }
  func.func @transform_0(%arg0: i32) -> (i32, i32) {
    %c0_i32 = arith.constant 0 : i32
    %c0_i32_0 = arith.constant 0 : i32
    return %arg0, %c0_i32 : i32, i32
  }
  func.func @transform_1(%arg0: i32) -> (i32, i32) {
    %c0_i32 = arith.constant 0 : i32
    %c0_i32_0 = arith.constant 0 : i32
    %c0_i32_1 = arith.constant 0 : i32
    return %c0_i32, %c0_i32_0 : i32, i32
  }
  func.func @transform_2(%arg0: i32) -> (i32, i32) {
    %c0_i32 = arith.constant 0 : i32
    %c0_i32_0 = arith.constant 0 : i32
    %c0_i32_1 = arith.constant 0 : i32
    return %c0_i32, %c0_i32_0 : i32, i32
  }
  func.func @transform_3(%arg0: i32) -> (i32, i32) {
    %c0_i32 = arith.constant 0 : i32
    %c0_i32_0 = arith.constant 0 : i32
    %c0_i32_1 = arith.constant 0 : i32
    return %c0_i32, %c0_i32_0 : i32, i32
  }
  func.func @transform_4(%arg0: i32) -> (i32, i32) {
    %c0_i32 = arith.constant 0 : i32
    %c0_i32_0 = arith.constant 0 : i32
    %c0_i32_1 = arith.constant 0 : i32
    return %c0_i32, %c0_i32_0 : i32, i32
  }
  func.func @transform_5(%arg0: i32) -> (i32, i32) {
    %c0_i32 = arith.constant 0 : i32
    %c0_i32_0 = arith.constant 0 : i32
    return %arg0, %c0_i32 : i32, i32
  }
}

</mosaic_0001>

<bundles_post_ra>
// kernel: tpu_custom_call.1
= control target key start
LH: loop header
LB: loop body
LE: loop exit
PB: predicated region body
PF: predicated region fallthrough
CT: control target
= control target key end

     0   :  { %v266_v1 = vmov 0.0   ;;  %vm267_vm0 = vmmov 0   ;;  %s339_s0 = inlined_call_operand.vmem [shape: f32[8,64], index: 0, kind: input, shape index: {}]   ;;  %s340_s1 = inlined_call_operand.vmem [shape: bf16[64,32], index: 1, kind: input, shape index: {}]   ;;  %s341_s2 = inlined_call_operand.vmem [shape: f32[1,32], index: 2, kind: input, shape index: {}]   ;;  %s342_s3 = inlined_call_operand.vmem [shape: bf16[32,16], index: 3, kind: input, shape index: {}]   ;;  %s343_s4 = inlined_call_operand.vmem [shape: f32[1,16], index: 4, kind: input, shape index: {}]   ;;  %s344_s5 = inlined_call_operand.hbm [shape: f32[8,16], index: 5, kind: output, shape index: {}]  }
   0x1   :  { %v236_v0 = vld [vmem:[%s340_s1] sm:$0xff]   ;;  %212 = vmatprep.subr.bf16.mxu0 %v266_v1  ;;  %224 = vmatprep.subr.bf16.mxu1 %v266_v1  ;;  %v237_v2 = vld [vmem:[%s340_s1 + $0x8] sm:$0xff]  }
   0x2   :  { %213 = vmatpush3.bf16.msra.mxu0 %v236_v0  ;;  %220 = vmatprep.mubr.msk.bf16.mxu0 %vm267_vm0, %v266_v1 }
   0x3   :  { %214 = vmatprep.subr.bf16.mxu0 %v266_v1  ;;  %228 = vmatprep.mubr.msk.bf16.mxu1 %vm267_vm0, %v266_v1 }
   0x4   :  { %10 = vsyncpa [#allocation3], 0  ;;  %v238_v3 = vld [vmem:[%s340_s1 + $0x10] sm:$0xff]   ;;  %v239_v4 = vld [vmem:[%s340_s1 + $0x18] sm:$0xff]   ;;  %vm56_vm1 = vcmask 523264   ;;  %v106_v9 = vlaneseq  ;;  %vm135_vm2 = vcmask 261120  }
   0x5   :  { %v22_v5 = vld [vmem:[%s339_s0] sm:$0xff]  ;;  %v241_v8 = vld [vmem:[%s342_s3 + $0x8] sm:$0xff]   ;;  %v268_v22 = vmov 0   ;;  %vm179_vm3 = vcmask 130048  }
   0x6   :  { %215 = vmatpush3.bf16.msra.mxu0 %v237_v2  ;;  %v23_v6 = vpack.c.bf16 %v22_v5, %v22_v5  ;;  %v240_v7 = vld [vmem:[%s342_s3] sm:$0xff]   ;;  %v107_v12 = vshrl.u32 %v106_v9, 7 }
   0x7   :  { %216 = vmatprep.subr.bf16.mxu0 %v266_v1  ;;  %225 = vmatpush3.bf16.msra.mxu1 %v240_v7  ;;  %v101_v10 = vld [vmem:[%s341_s2] sm:$0x1]  ;;  %s269_s2 = smov [#allocation2]  }
   0x8   :  { %226 = vmatprep.subr.bf16.mxu1 %v266_v1  ;;  %v102_v11 = vpack.c.bf16 %v101_v10, %v101_v10  ;;  %v108_v14 = vsub.s32 0, %v107_v12  ;;  %v200_v24 = vld [vmem:[%s343_s4] ss:$0 sm:$0xff]  ;;  %s187_s8 = sshll.u32 %s269_s2, 4  ;;  %s188_s8 = int_to_ptr.vmem [resolvable:$true] %s187_s8 }
   0x9   :  { %s242_s9 = scalar_lea.vmem %s188_s8, 128  ;;  %p247_p1 = scmp.lt.s32.totalorder %s188_s8, %s188_s8 }
   0xa   :  { %217 = vmatpush3.bf16.msra.mxu0 %v238_v3  ;;  %v104_v13 = vpack.i.b16 %v102_v11, %v102_v11  ;;  %p243_p0 = scmp.ne.s32.totalorder %s188_s8, %s242_s9  ;;  %p248_p2 = scmp.lt.s32.totalorder %s242_s9, %s242_s9 }
   0xb   :  { %218 = vmatprep.subr.bf16.mxu0 %v266_v1  ;;  %227 = vmatpush3.bf16.msra.mxu1 %v241_v8 }
   0xc   :  { %v109_v15 = vrot.slane %v104_v13, %v108_v14  ;;  %p249_p3 = por %p248_p2, %p247_p1 }
   0xe   :  { %219 = vmatpush3.bf16.msra.mxu0 %v239_v4  ;;  %p250_p4 = pnand %p249_p3, %p243_p0 }
  0x11   :  { %221 = vmatmul.mubr.msk.bf16.vlgmr.msra.gmra.mrb[0].mxu0 %vm56_vm1, %v23_v6 }
  0xe4   :  { %v94_v16 = vpop.f32.mrb[0].mxu0 }
  0xe5   :  { %v100_v17 = vpack.c.bf16 %v94_v16, %v94_v16  ;;  %v222_v18 = vpop.f32.mrb[1].mxu0 }
  0xe6   :  { %v97_v19 = vpop.f32.mrb[2].mxu0 }
  0xe7   :  { %v110_v20 = vadd.bf16 %v109_v15, %v100_v17  ;;  %v223_v21 = vpop.f32.mrb[3].mxu0 }
  0xe9   :  { %v111_v23 = vmax.bf16 %v268_v22, %v110_v20 }
  0xeb   :  { %229 = vmatmul.mubr.msk.bf16.vlgmr.msra.gmra.mrb[0].mxu1 %vm135_vm2, %v111_v23 }
 0x1be   :  { %v173_v25 = vpop.f32.mrb[0].mxu1 }
 0x1bf   :  { %v174_v26 = vadd.f32 %v200_v24, %v173_v25  ;;  %v230_v27 = vpop.f32.mrb[1].mxu1 }
 0x1c0   :  { %v176_v28 = vpop.f32.mrb[2].mxu1 }
 0x1c1   :  { %v231_v29 = vpop.f32.mrb[3].mxu1  ;;  %180 = vst.msk [vmem:[#allocation2] sm:$0xff] %vm179_vm3, %v174_v26 }
 0x1c2   :  { %253 = shalt.err (!%p250_p4)
}
 0x1c3   :  { %s254_s4 = scalar_lea.hbm %s344_s5, 128 }
 0x1c4   :  { %p255_p5 = scmp.ne.s32.totalorder %s344_s5, %s254_s4  ;;  %p258_p6 = scmp.lt.u32.totalorder %s254_s4, %s344_s5 }
 0x1c6   :  { %p260_p7 = pnand %p258_p6, %p255_p5 }
 0x1c8   :  { %263 = shalt.err (!%p260_p7)
}
 0x1c9   :  { %190 = dma.vmem_to_hbm [thread:$0]  %s188_s8, 128, %s344_s5, [#allocation3]  }
 0x1ca   :  { %264 = dma.done.wait [#allocation3], 128  }
 0x1cb   :  { %265 = vsyncadd [#allocation3], 4294967168 }
 0x1cc   :  { %194 = vsyncpa [#allocation3], 1 }

</bundles_post_ra>
